<compile_context>
chip_gen: v7x
topology: tpu7x:2x2x1
jax: 0.10.0
libtpu: 0.0.40
codegen_flags: <defaults>
</compile_context>

<pallas_src>
import math
import jax
import jax.numpy as jnp
from jax import lax
from jax.experimental import pallas as pl
from jax.experimental.pallas import tpu as pltpu


def _round_up(x, m):
    return (x + m - 1) // m * m


def _linear_kernel(x_ref, w_ref, b_ref, o_ref):
    """One (tb, tc) output tile. The output block is resident across the K
    grid axis and is used directly as the f32 accumulator (no scratch)."""
    k = pl.program_id(2)

    @pl.when(k == 0)
    def _():
        # Initialize the resident output tile with the broadcast bias:
        # replaces both the zero-init and the separate finalize bias-add.
        o_ref[...] = jnp.broadcast_to(b_ref[...], o_ref.shape)

    # bf16 x bf16 -> f32 on the MXU. Contracting the LAST dim of BOTH
    # operands computes x @ W.T with the weight tile in its native (C, D)
    # layout -- no materialized transpose.
    o_ref[...] += lax.dot_general(
        x_ref[...], w_ref[...],
        dimension_numbers=(((1,), (1,)), ((), ())),
        preferred_element_type=jnp.float32)


def prepare_softmax_head_params(weight, bias, *, tc=512, tk=2048):
    """Pad + cast the parameters ONCE (do this at parameter-creation time in
    production, not on every forward call).

    weight: (out_features, in_features), bias: (out_features,)
    Returns (w_padded_bf16 (Cp, Dp), b_padded_f32 (1, Cp), tc, tk)."""
    C, D = weight.shape
    assert bias.shape == (C,)
    # Shrink tiles for small problems while keeping lane alignment.
    tc = min(tc, _round_up(C, 128))
    tk = min(tk, _round_up(D, 128))
    Cp, Dp = _round_up(C, tc), _round_up(D, tk)
    # Zero-padding is exact for a linear layer; padded rows/cols are sliced off.
    wp = jnp.pad(weight, ((0, Cp - C), (0, Dp - D))).astype(jnp.bfloat16)
    bp = jnp.pad(bias.astype(jnp.float32), ((0, Cp - C),)).reshape(1, Cp)
    return wp, bp, tc, tk


def softmax_head_forward(x, w_padded, b_padded, tc, tk, out_features,
                         label=None, *, tb=512):
    """x: (B, in_features); w_padded/b_padded/tc/tk from
    prepare_softmax_head_params. Returns (B, out_features) f32."""
    del label  # unused by the module's forward
    B, D = x.shape
    Cp, Dp = w_padded.shape
    assert b_padded.shape == (1, Cp)
    assert D <= Dp and Cp % tc == 0 and Dp % tk == 0

    # Batch tile: whole (padded) batch when it fits, so the weight matrix is
    # streamed from HBM exactly once.
    tb = min(tb, _round_up(B, 8))
    Bp = _round_up(B, tb)
    xp = jnp.pad(x, ((0, Bp - B), (0, Dp - D))).astype(jnp.bfloat16)

    grid = (Bp // tb, Cp // tc, Dp // tk)

    flops = 2 * Bp * Cp * Dp
    bytes_accessed = ((Cp // tc) * Bp * Dp * 2      # x re-streamed per C tile
                      + (Bp // tb) * Cp * Dp * 2    # weight re-streamed per B tile
                      + Bp * Cp * 4                 # output
                      + Cp * 4)                     # bias

    out = pl.pallas_call(
        _linear_kernel,
        out_shape=jax.ShapeDtypeStruct((Bp, Cp), jnp.float32),
        grid_spec=pltpu.PrefetchScalarGridSpec(
            num_scalar_prefetch=0,
            grid=grid,
            in_specs=[
                pl.BlockSpec((tb, tk), lambda i, j, k: (i, k)),   # x tile (bf16)
                pl.BlockSpec((tc, tk), lambda i, j, k: (j, k)),   # weight tile (bf16)
                pl.BlockSpec((1, tc), lambda i, j, k: (0, j)),    # bias tile (f32)
            ],
            out_specs=pl.BlockSpec((tb, tc), lambda i, j, k: (i, j)),
        ),
        compiler_params=pltpu.CompilerParams(
            dimension_semantics=("parallel", "parallel", "arbitrary"),
            # Raised above the 16/32 MiB scoped defaults, but leaves headroom
            # under v7x's 64 MiB physical VMEM.
            vmem_limit_bytes=48 * 1024 * 1024,
        ),
        cost_estimate=pl.CostEstimate(
            flops=flops, transcendentals=0, bytes_accessed=bytes_accessed),
    )(xp, w_padded, b_padded)

    return out[:B, :out_features]


def _xavier_uniform(key, shape):
    # nn.init.xavier_uniform_ for a (fan_out, fan_in) weight, gain = 1
    fan_out, fan_in = shape
    bound = math.sqrt(6.0 / (fan_in + fan_out))
    return jax.random.uniform(key, shape, jnp.float32, minval=-bound, maxval=bound)


if __name__ == "__main__":
    key = jax.random.PRNGKey(0)
    k_x, k_w, k_l = jax.random.split(key, 3)

    B, in_features, out_features = 8, 32, 16
    x = jax.random.normal(k_x, (B, in_features), jnp.float32)
    weight = _xavier_uniform(k_w, (out_features, in_features))
    bias = jnp.zeros((out_features,), jnp.float32)   # nn.init.zeros_(self.bias)
    label = jax.random.randint(k_l, (B,), 0, out_features, jnp.int32)  # unused by forward

    # Parameters are padded / cast to bf16 once, outside the forward pass.
    w_padded, b_padded, tc, tk = prepare_softmax_head_params(weight, bias)

    out = softmax_head_forward(x, w_padded, b_padded, tc, tk, out_features, label)
    jax.block_until_ready(out)

    # Pure-JAX reference: F.linear(x, W, b) = x @ W.T + b (f32). The kernel
    # uses bf16 operands with f32 accumulation, so tolerance is loosened.
    ref = x @ weight.T + bias[None, :]
    assert out.shape == (B, out_features), out.shape
    err = float(jnp.max(jnp.abs(out - ref)))
    assert jnp.allclose(out, ref, atol=5e-2, rtol=5e-2), err
    print("KERNEL_OK")
</pallas_src>

<mosaic_0001>
module attributes {stable_mosaic.version = 11 : i64} {
  func.func @_linear_kernel(%arg0: i32, %arg1: i32, %arg2: i32, %arg3: memref<8x128xbf16, #tpu.memory_space<vmem>>, %arg4: memref<128x128xbf16, #tpu.memory_space<vmem>>, %arg5: memref<1x128xf32, #tpu.memory_space<vmem>>, %arg6: memref<8x128xf32, #tpu.memory_space<vmem>>) attributes {dimension_semantics = [#tpu.dimension_semantics<parallel>, #tpu.dimension_semantics<parallel>, #tpu.dimension_semantics<arbitrary>], iteration_bounds = array<i64: 1, 1, 1>, scalar_prefetch = 0 : i64, scratch_operands = 0 : i64, tpu.core_type = #tpu.core_type<tc>, window_params = [{transform_indices = @transform_0, window_bounds = array<i64: 8, 128>}, {transform_indices = @transform_1, window_bounds = array<i64: 128, 128>}, {transform_indices = @transform_2, window_bounds = array<i64: 1, 128>}, {transform_indices = @transform_3, window_bounds = array<i64: 8, 128>}]} {
    %c0_i32 = arith.constant 0 : i32
    %0 = arith.cmpi eq, %arg2, %c0_i32 : i32
    %1 = arith.extui %0 : i1 to i32
    %c0_i32_0 = arith.constant 0 : i32
    %2 = arith.cmpi ne, %1, %c0_i32_0 : i32
    scf.if %2 {
      %c0_8 = arith.constant 0 : index
      %c0_9 = arith.constant 0 : index
      %9 = vector.load %arg5[%c0_8, %c0_9] : memref<1x128xf32, #tpu.memory_space<vmem>>, vector<1x128xf32>
      %10 = vector.shape_cast %9 : vector<1x128xf32> to vector<1x128xf32>
      %11 = vector.broadcast %10 : vector<1x128xf32> to vector<8x128xf32>
      %c0_10 = arith.constant 0 : index
      %c0_11 = arith.constant 0 : index
      %12 = vector.load %arg6[%c0_10, %c0_11] : memref<8x128xf32, #tpu.memory_space<vmem>>, vector<8x128xf32>
      tpu.vector_store %arg6[%c0_10, %c0_11], %11 {strides = array<i32>} : memref<8x128xf32, #tpu.memory_space<vmem>>, vector<8x128xf32>,
    } else {
    }
    %c0 = arith.constant 0 : index
    %c0_1 = arith.constant 0 : index
    %3 = vector.load %arg6[%c0, %c0_1] : memref<8x128xf32, #tpu.memory_space<vmem>>, vector<8x128xf32>
    %c0_2 = arith.constant 0 : index
    %c0_3 = arith.constant 0 : index
    %4 = vector.load %arg3[%c0_2, %c0_3] : memref<8x128xbf16, #tpu.memory_space<vmem>>, vector<8x128xbf16>
    %c0_4 = arith.constant 0 : index
    %c0_5 = arith.constant 0 : index
    %5 = vector.load %arg4[%c0_4, %c0_5] : memref<128x128xbf16, #tpu.memory_space<vmem>>, vector<128x128xbf16>
    %cst = arith.constant dense<0.000000e+00> : vector<8x128xf32>
    %6 = tpu.matmul %4, %5, %cst {dimension_numbers = #tpu.dot_dimension_numbers<[1], [1], [0], [0], [0, 0, 1, 0], [], []>} : vector<8x128xbf16>, vector<128x128xbf16>, vector<8x128xf32> -> vector<8x128xf32>
    %7 = arith.addf %3, %6 : vector<8x128xf32>
    %c0_6 = arith.constant 0 : index
    %c0_7 = arith.constant 0 : index
    %8 = vector.load %arg6[%c0_6, %c0_7] : memref<8x128xf32, #tpu.memory_space<vmem>>, vector<8x128xf32>
    tpu.vector_store %arg6[%c0_6, %c0_7], %7 {strides = array<i32>} : memref<8x128xf32, #tpu.memory_space<vmem>>, vector<8x128xf32>,
    return
  }
  func.func @transform_0(%arg0: i32, %arg1: i32, %arg2: i32) -> (i32, i32) {
    %c0_i32 = arith.constant 0 : i32
    return %arg0, %arg2 : i32, i32
  }
  func.func @transform_1(%arg0: i32, %arg1: i32, %arg2: i32) -> (i32, i32) {
    %c0_i32 = arith.constant 0 : i32
    return %arg1, %arg2 : i32, i32
  }
  func.func @transform_2(%arg0: i32, %arg1: i32, %arg2: i32) -> (i32, i32) {
    %c0_i32 = arith.constant 0 : i32
    %c0_i32_0 = arith.constant 0 : i32
    return %c0_i32, %arg1 : i32, i32
  }
  func.func @transform_3(%arg0: i32, %arg1: i32, %arg2: i32) -> (i32, i32) {
    %c0_i32 = arith.constant 0 : i32
    return %arg0, %arg1 : i32, i32
  }
}

</mosaic_0001>

<bundles_post_ra>
// kernel: tpu_custom_call.1
= control target key start
LH: loop header
LB: loop body
LE: loop exit
PB: predicated region body
PF: predicated region fallthrough
CT: control target
= control target key end

     0   :  { %8 = vsyncpa [#allocation3], 0  ;;  %s376_s0 = inlined_call_operand.hbm [shape: bf16[8,128], index: 0, kind: input, shape index: {}]   ;;  %s377_s1 = inlined_call_operand.hbm [shape: bf16[128,128], index: 1, kind: input, shape index: {}]   ;;  %s378_s2 = inlined_call_operand.vmem [shape: f32[1,128], index: 2, kind: input, shape index: {}]   ;;  %s379_s3 = inlined_call_operand.hbm [shape: f32[8,128], index: 3, kind: output, shape index: {}]  }
   0x1   :  { %9 = vsyncpa [#allocation6], 0 }
   0x2   :  { %10 = vsyncpa [#allocation4], 0  ;;  %s303_s12 = smov [#allocation2]   ;;  %s304_s14 = smov [#allocation5]  }
   0x3   :  { %s17_s13 = sshll.u32 %s303_s12, 4  ;;  %s26_s15 = sshll.u32 %s304_s14, 4  ;;  %s18_s13 = int_to_ptr.vmem [resolvable:$true] %s17_s13  ;;  %s330_s15 = int_to_ptr.vmem [resolvable:$true] %s26_s15 }
   0x4   :  { %s231_s18 = scalar_lea.hbm %s376_s0, 64 }
   0x5   :  { %p232_p0 = scmp.ne.s32.totalorder %s376_s0, %s231_s18  ;;  %p235_p1 = scmp.lt.u32.totalorder %s231_s18, %s376_s0 }
   0x7   :  { %p237_p2 = pnand %p235_p1, %p232_p0 }
   0x9   :  { %240 = shalt.err (!%p237_p2)
}
   0xa   :  { %s241_s23 = scalar_lea.vmem %s18_s13, 64  ;;  %p246_p4 = scmp.lt.s32.totalorder %s18_s13, %s18_s13 }
   0xb   :  { %p242_p3 = scmp.ne.s32.totalorder %s18_s13, %s241_s23  ;;  %p247_p5 = scmp.lt.s32.totalorder %s241_s23, %s241_s23 }
   0xd   :  { %p248_p6 = por %p247_p5, %p246_p4 }
   0xf   :  { %p249_p7 = pnand %p248_p6, %p242_p3 }
  0x11   :  { %252 = shalt.err (!%p249_p7)
}
  0x12   :  { %20 = dma.hbm_to_vmem [thread:$0]  %s376_s0, 64, %s18_s13, [#allocation3]  }
  0x13   :  { %s253_s28 = scalar_lea.hbm %s377_s1, 1024 }
  0x14   :  { %p254_p8 = scmp.ne.s32.totalorder %s377_s1, %s253_s28  ;;  %p257_p9 = scmp.lt.u32.totalorder %s253_s28, %s377_s1 }
  0x16   :  { %p259_p10 = pnand %p257_p9, %p254_p8 }
  0x18   :  { %262 = shalt.err (!%p259_p10)
}
  0x19   :  { %s263_s6 = scalar_lea.vmem %s330_s15, 1024  ;;  %p268_p12 = scmp.lt.s32.totalorder %s330_s15, %s330_s15 }
  0x1a   :  { %p264_p11 = scmp.ne.s32.totalorder %s330_s15, %s263_s6  ;;  %p269_p13 = scmp.lt.s32.totalorder %s263_s6, %s263_s6 }
  0x1c   :  { %p270_p0 = por %p269_p13, %p268_p12 }
  0x1e   :  { %p271_p1 = pnand %p270_p0, %p264_p11 }
  0x20   :  { %274 = shalt.err (!%p271_p1)
}
  0x21   :  { %s305_s0 = smov 64   ;;  %s306_s7 = smov 4  }
  0x22   :  { %32 = dma.hbm_to_vmem [thread:$0]  %s377_s1, 1024, %s330_s15, [#allocation6], %s305_s0, %s305_s0, %s306_s7  }
  0x23   :  { %297 = dma.done.wait [#allocation3], 64  }
  0x24   :  { %298 = vsyncadd [#allocation3], 4294967232 }
  0x25   :  { %299 = dma.done.wait [#allocation6], 1024  }
  0x26   :  { %300 = vsyncadd [#allocation6], 4294966272  ;;  %v307_v0 = vmov 0.0   ;;  %vm308_vm0 = vmmov 0   ;;  %v223_v1 = vld [vmem:[#allocation5] sm:$0xff]   ;;  %v224_v2 = vld [vmem:[#allocation5 + $0x8] sm:$0xff]  }
  0x27   :  { %196 = vmatprep.subr.bf16.mxu0 %v307_v0  ;;  %212 = vmatprep.mubr.msk.bf16.mxu0 %vm308_vm0, %v307_v0  ;;  %v225_v3 = vld [vmem:[#allocation5 + $0x10] sm:$0xff]   ;;  %v226_v4 = vld [vmem:[#allocation5 + $0x18] sm:$0xff]   ;;  %v227_v5 = vld [vmem:[#allocation5 + $0x20] sm:$0xff]   ;;  %s309_s11 = smov [#allocation7]  }
  0x28   :  { %197 = vmatpush3.bf16.xpose.msra.mxu0 %v223_v1  ;;  %v228_v6 = vld [vmem:[#allocation5 + $0x28] sm:$0xff]   ;;  %v229_v7 = vld [vmem:[#allocation5 + $0x30] sm:$0xff]   ;;  %v230_v8 = vld [vmem:[#allocation5 + $0x38] sm:$0xff]   ;;  %s168_s12 = sshll.u32 %s309_s11, 4  ;;  %s169_s12 = int_to_ptr.vmem [resolvable:$true] %s168_s12 }
  0x29   :  { %198 = vmatprep.subr.bf16.mxu0 %v307_v0  ;;  %v55_v9 = vld [vmem:[#allocation2] sm:$0xf]  ;;  %s275_s13 = scalar_lea.vmem %s169_s12, 128  ;;  %p280_p3 = scmp.lt.s32.totalorder %s169_s12, %s169_s12 }
  0x2a   :  { %v178_v10 = vld [vmem:[%s378_s2] ss:$0 sm:$0xff]  ;;  %p276_p2 = scmp.ne.s32.totalorder %s169_s12, %s275_s13  ;;  %p281_p4 = scmp.lt.s32.totalorder %s275_s13, %s275_s13 }
  0x2c   :  { %p282_p5 = por %p281_p4, %p280_p3 }
  0x2e   :  { %p283_p6 = pnand %p282_p5, %p276_p2 }
  0x30   :  { %199 = vmatpush3.bf16.xpose.msra.mxu0 %v224_v2 }
  0x31   :  { %200 = vmatprep.subr.bf16.mxu0 %v307_v0 }
  0x38   :  { %201 = vmatpush3.bf16.xpose.msra.mxu0 %v225_v3 }
  0x39   :  { %202 = vmatprep.subr.bf16.mxu0 %v307_v0 }
  0x40   :  { %203 = vmatpush3.bf16.xpose.msra.mxu0 %v226_v4 }
  0x41   :  { %204 = vmatprep.subr.bf16.mxu0 %v307_v0 }
  0x48   :  { %205 = vmatpush3.bf16.xpose.msra.mxu0 %v227_v5 }
  0x49   :  { %206 = vmatprep.subr.bf16.mxu0 %v307_v0 }
  0x50   :  { %207 = vmatpush3.bf16.xpose.msra.mxu0 %v228_v6 }
  0x51   :  { %208 = vmatprep.subr.bf16.mxu0 %v307_v0 }
  0x58   :  { %209 = vmatpush3.bf16.xpose.msra.mxu0 %v229_v7 }
  0x59   :  { %210 = vmatprep.subr.bf16.mxu0 %v307_v0 }
  0x60   :  { %211 = vmatpush3.bf16.xpose.msra.mxu0 %v230_v8 }
  0x67   :  { %213 = vmatmul.mubr.bf16.vlgmr.msra.gmra.mrb[0].mxu0 %v55_v9 }
 0x13a   :  { %v154_v11 = vpop.f32.mrb[0].mxu0 }
 0x13b   :  { %v160_v12 = vadd.f32 %v178_v10, %v154_v11  ;;  %v214_v13 = vpop.f32.mrb[1].mxu0 }
 0x13c   :  { %v157_v14 = vpop.f32.mrb[2].mxu0 }
 0x13d   :  { %161 = vst [vmem:[#allocation7] sm:$0xff] %v160_v12  ;;  %v215_v15 = vpop.f32.mrb[3].mxu0 }
 0x13e   :  { %286 = shalt.err (!%p283_p6)
}
 0x13f   :  { %s287_s2 = scalar_lea.hbm %s379_s3, 128 }
 0x140   :  { %p288_p7 = scmp.ne.s32.totalorder %s379_s3, %s287_s2  ;;  %p291_p8 = scmp.lt.u32.totalorder %s287_s2, %s379_s3 }
 0x142   :  { %p293_p9 = pnand %p291_p8, %p288_p7 }
 0x144   :  { %296 = shalt.err (!%p293_p9)
}
 0x145   :  { %171 = dma.vmem_to_hbm [thread:$0]  %s169_s12, 128, %s379_s3, [#allocation4]  }
 0x146   :  { %301 = dma.done.wait [#allocation4], 128  }
 0x147   :  { %302 = vsyncadd [#allocation4], 4294967168 }
 0x148   :  { %175 = vsyncpa [#allocation3], 1 }
 0x149   :  { %176 = vsyncpa [#allocation6], 1 }
 0x14a   :  { %177 = vsyncpa [#allocation4], 1 }

</bundles_post_ra>
